<compile_context>
chip_gen: v6e
topology: v6e:2x2x1
jax: 0.10.0
libtpu: 0.0.40
codegen_flags: <defaults>
</compile_context>

<pallas_src>
import functools

import jax
import jax.numpy as jnp
from jax.experimental import pallas as pl
from jax.experimental.pallas import tpu as pltpu


def _round_down(x, m):
    return (x // m) * m


def _round_up(x, m):
    return ((x + m - 1) // m) * m


def _skip_kernel(x_ref, w1_ref, b1_ref, w2_ref, b2_ref, o_ref, *, negative_slope):
    # x_ref / o_ref: (C, TL)   w1_ref / w2_ref: (C, C)   b1_ref / b2_ref: (C, 1)
    x = x_ref[...].astype(jnp.float32)          # upcast after DMA (bf16-friendly)
    h = jnp.dot(w1_ref[...], x, preferred_element_type=jnp.float32) + b1_ref[...]
    h = jnp.where(h > 0, h, negative_slope * h)  # LeakyReLU
    y = jnp.dot(w2_ref[...], h, preferred_element_type=jnp.float32) + b2_ref[...]
    o_ref[...] = (x + y).astype(o_ref.dtype)     # residual add, store in x dtype


def _plan_tiles(N, C, HW):
    """Pick the spatial tile width TL (lane axis) and a scoped-VMEM limit.

    TL is a multiple of 128 (or the full H*W) sized from a per-generation VMEM
    byte budget, counting the f32 sublane padding of (C, TL) blocks.
    """
    c_pad = max(8, _round_up(C, 8))          # (C, TL) f32 pads to >= 8 sublanes
    try:
        vmem_phys = pltpu.get_tpu_info().vmem_capacity_bytes
    except Exception:
        vmem_phys = 64 * 1024 * 1024         # v7x worst case as safe fallback

    # Per grid step: 2 x in-buffers + 2 out-buffers + h + y ~= 6 (Cp, TL) f32 blocks.
    budget = min(vmem_phys // 4, 24 * 1024 * 1024)
    tl = max(128, _round_down(budget // (6 * c_pad * 4), 128))

    if tl >= HW:
        tl = HW                              # tiny problem: one step per batch element
    else:
        # Keep >= 4 total grid steps so v7x's two TCs both get pipelined work.
        while N * pl.cdiv(HW, tl) < 4 and tl > 128:
            tl = max(128, _round_down(tl // 2, 128))

    per_step = 6 * c_pad * max(tl, 128) * 4 + 4 * c_pad * 128 * 4  # blocks + weights/biases
    vmem_limit = int(min(vmem_phys // 2,
                         max(32 * 1024 * 1024, per_step + (8 << 20))))
    return tl, vmem_limit


def skip_connection(x_nchw, w1, b1, w2, b2, *, negative_slope=0.01):
    """out = x + conv1x1_2(leaky_relu(conv1x1_1(x)))  (SkipConnection.forward).

    x_nchw: (N, C, H, W).
    w1, w2: (C_out, C_in) = Conv2d(C, C, 1).weight[:, :, 0, 0].
    b1, b2: (C,).
    """
    N, C, H, W = x_nchw.shape
    HW = H * W

    # NCHW -> (N, C, H*W): pure reshape, no transpose / extra HBM pass.
    # Keep the native dtype; the upcast to f32 happens inside the kernel.
    x3d = x_nchw.reshape(N, C, HW)

    w1 = w1.astype(jnp.float32)
    w2 = w2.astype(jnp.float32)
    b1_2d = b1.reshape(C, 1).astype(jnp.float32)
    b2_2d = b2.reshape(C, 1).astype(jnp.float32)

    TL, vmem_limit = _plan_tiles(N, C, HW)
    grid = (N, pl.cdiv(HW, TL))

    itemsize = jnp.dtype(x3d.dtype).itemsize
    cost = pl.CostEstimate(
        flops=4 * N * HW * C * C + 4 * N * HW * C,
        transcendentals=0,
        bytes_accessed=2 * N * C * HW * itemsize + 2 * C * C * 4 + 2 * C * 4,
    )

    kernel = functools.partial(_skip_kernel, negative_slope=negative_slope)

    out3d = pl.pallas_call(
        kernel,
        out_shape=jax.ShapeDtypeStruct((N, C, HW), x3d.dtype),
        grid=grid,
        in_specs=[
            # batch dim squeezed out; kernel sees (C, TL), lanes = spatial (dense)
            pl.BlockSpec((None, C, TL), lambda n, l: (n, 0, l)),
            pl.BlockSpec((C, C), lambda n, l: (0, 0)),   # w1, VMEM-resident
            pl.BlockSpec((C, 1), lambda n, l: (0, 0)),   # b1
            pl.BlockSpec((C, C), lambda n, l: (0, 0)),   # w2
            pl.BlockSpec((C, 1), lambda n, l: (0, 0)),   # b2
        ],
        out_specs=pl.BlockSpec((None, C, TL), lambda n, l: (n, 0, l)),
        # Each block is read before being written at the same offset -> safe to
        # donate x's HBM buffer to the output (effective when the caller donates x).
        input_output_aliases={0: 0},
        compiler_params=pltpu.CompilerParams(
            dimension_semantics=("parallel", "parallel"),
            vmem_limit_bytes=vmem_limit,
        ),
        cost_estimate=cost,
    )(x3d, w1, b1_2d, w2, b2_2d)

    # (N, C, H*W) -> NCHW: pure reshape.
    return out3d.reshape(N, C, H, W)


def _reference(x_nchw, w1, b1, w2, b2, negative_slope=0.01):
    """Pure-JAX reference of x + conv1x1(lrelu(conv1x1(x)))."""
    N, C, H, W = x_nchw.shape
    x3 = x_nchw.reshape(N, C, H * W).astype(jnp.float32)
    h = jnp.einsum("oc,ncl->nol", w1, x3) + b1[None, :, None]
    h = jnp.where(h > 0, h, negative_slope * h)
    y = jnp.einsum("oc,ncl->nol", w2, h) + b2[None, :, None]
    return (x3 + y).reshape(N, C, H, W).astype(x_nchw.dtype)


if __name__ == "__main__":
    key = jax.random.PRNGKey(0)
    kx, k1, kb1, k2, kb2 = jax.random.split(key, 5)

    N, C, H, W = 2, 4, 16, 16
    x = jax.random.normal(kx, (N, C, H, W), dtype=jnp.float32)

    # Deterministic "Conv2d(C, C, 1)" parameters (weight[:, :, 0, 0] shape (C, C)).
    scale = 1.0 / jnp.sqrt(jnp.float32(C))
    w1 = jax.random.uniform(k1, (C, C), jnp.float32, -scale, scale)
    b1 = jax.random.uniform(kb1, (C,), jnp.float32, -scale, scale)
    w2 = jax.random.uniform(k2, (C, C), jnp.float32, -scale, scale)
    b2 = jax.random.uniform(kb2, (C,), jnp.float32, -scale, scale)

    run = jax.jit(skip_connection)
    out = jax.block_until_ready(run(x, w1, b1, w2, b2))

    ref = _reference(x, w1, b1, w2, b2)
    assert out.shape == (N, C, H, W)
    assert jnp.allclose(out, ref, atol=1e-5, rtol=1e-5)

    print("KERNEL_OK")
</pallas_src>

<mosaic_0001>
module attributes {stable_mosaic.version = 11 : i64} {
  func.func @_skip_kernel(%arg0: i32, %arg1: i32, %arg2: memref<1x4x256xf32, #tpu.memory_space<vmem>>, %arg3: memref<4x4xf32, #tpu.memory_space<vmem>>, %arg4: memref<4x1xf32, #tpu.memory_space<vmem>>, %arg5: memref<4x4xf32, #tpu.memory_space<vmem>>, %arg6: memref<4x1xf32, #tpu.memory_space<vmem>>, %arg7: memref<1x4x256xf32, #tpu.memory_space<vmem>>) attributes {dimension_semantics = [#tpu.dimension_semantics<parallel>, #tpu.dimension_semantics<parallel>], iteration_bounds = array<i64: 2, 1>, scalar_prefetch = 0 : i64, scratch_operands = 0 : i64, tpu.core_type = #tpu.core_type<tc>, window_params = [{transform_indices = @transform_0, window_bounds = array<i64: 1, 4, 256>}, {pipeline_mode = #tpu.pipeline_mode<synchronous>, transform_indices = @transform_1, window_bounds = array<i64: 4, 4>}, {pipeline_mode = #tpu.pipeline_mode<synchronous>, transform_indices = @transform_2, window_bounds = array<i64: 4, 1>}, {pipeline_mode = #tpu.pipeline_mode<synchronous>, transform_indices = @transform_3, window_bounds = array<i64: 4, 4>}, {pipeline_mode = #tpu.pipeline_mode<synchronous>, transform_indices = @transform_4, window_bounds = array<i64: 4, 1>}, {transform_indices = @transform_5, window_bounds = array<i64: 1, 4, 256>}]} {
    %c0 = arith.constant 0 : index
    %c0_0 = arith.constant 0 : index
    %c0_1 = arith.constant 0 : index
    %0 = vector.load %arg2[%c0, %c0_0, %c0_1] : memref<1x4x256xf32, #tpu.memory_space<vmem>>, vector<1x4x256xf32>
    %1 = vector.shape_cast %0 : vector<1x4x256xf32> to vector<4x256xf32>
    %c0_2 = arith.constant 0 : index
    %c0_3 = arith.constant 0 : index
    %2 = vector.load %arg3[%c0_2, %c0_3] : memref<4x4xf32, #tpu.memory_space<vmem>>, vector<4x4xf32>
    %cst = arith.constant dense<0.000000e+00> : vector<4x256xf32>
    %3 = tpu.matmul %2, %1, %cst {dimension_numbers = #tpu.dot_dimension_numbers<[1], [0], [0], [1], [0, 0, 1, 1], [], []>} : vector<4x4xf32>, vector<4x256xf32>, vector<4x256xf32> -> vector<4x256xf32>
    %c0_4 = arith.constant 0 : index
    %c0_5 = arith.constant 0 : index
    %4 = vector.load %arg4[%c0_4, %c0_5] : memref<4x1xf32, #tpu.memory_space<vmem>>, vector<4x1xf32>
    %5 = vector.broadcast %4 : vector<4x1xf32> to vector<4x256xf32>
    %6 = arith.addf %3, %5 : vector<4x256xf32>
    %cst_6 = arith.constant 0.000000e+00 : f32
    %7 = vector.broadcast %cst_6 : f32 to vector<4x256xf32>
    %8 = arith.cmpf ogt, %6, %7 : vector<4x256xf32>
    %cst_7 = arith.constant 0.00999999977 : f32
    %9 = vector.broadcast %cst_7 : f32 to vector<4x256xf32>
    %10 = arith.mulf %9, %6 : vector<4x256xf32>
    %11 = arith.select %8, %6, %10 : vector<4x256xi1>, vector<4x256xf32>
    %c0_8 = arith.constant 0 : index
    %c0_9 = arith.constant 0 : index
    %12 = vector.load %arg5[%c0_8, %c0_9] : memref<4x4xf32, #tpu.memory_space<vmem>>, vector<4x4xf32>
    %cst_10 = arith.constant dense<0.000000e+00> : vector<4x256xf32>
    %13 = tpu.matmul %12, %11, %cst_10 {dimension_numbers = #tpu.dot_dimension_numbers<[1], [0], [0], [1], [0, 0, 1, 1], [], []>} : vector<4x4xf32>, vector<4x256xf32>, vector<4x256xf32> -> vector<4x256xf32>
    %c0_11 = arith.constant 0 : index
    %c0_12 = arith.constant 0 : index
    %14 = vector.load %arg6[%c0_11, %c0_12] : memref<4x1xf32, #tpu.memory_space<vmem>>, vector<4x1xf32>
    %15 = vector.broadcast %14 : vector<4x1xf32> to vector<4x256xf32>
    %16 = arith.addf %13, %15 : vector<4x256xf32>
    %17 = arith.addf %1, %16 : vector<4x256xf32>
    %c0_13 = arith.constant 0 : index
    %c0_14 = arith.constant 0 : index
    %c0_15 = arith.constant 0 : index
    %18 = vector.load %arg7[%c0_13, %c0_14, %c0_15] : memref<1x4x256xf32, #tpu.memory_space<vmem>>, vector<1x4x256xf32>
    %19 = vector.shape_cast %18 : vector<1x4x256xf32> to vector<4x256xf32>
    %20 = vector.shape_cast %17 : vector<4x256xf32> to vector<1x4x256xf32>
    tpu.vector_store %arg7[%c0_13, %c0_14, %c0_15], %20 {strides = array<i32>} : memref<1x4x256xf32, #tpu.memory_space<vmem>>, vector<1x4x256xf32>,
    return
  }
  func.func @transform_0(%arg0: i32, %arg1: i32) -> (i32, i32, i32) {
    %c0_i32 = arith.constant 0 : i32
    %c0_i32_0 = arith.constant 0 : i32
    return %arg0, %c0_i32, %arg1 : i32, i32, i32
  }
  func.func @transform_1(%arg0: i32, %arg1: i32) -> (i32, i32) {
    %c0_i32 = arith.constant 0 : i32
    %c0_i32_0 = arith.constant 0 : i32
    %c0_i32_1 = arith.constant 0 : i32
    return %c0_i32, %c0_i32_0 : i32, i32
  }
  func.func @transform_2(%arg0: i32, %arg1: i32) -> (i32, i32) {
    %c0_i32 = arith.constant 0 : i32
    %c0_i32_0 = arith.constant 0 : i32
    %c0_i32_1 = arith.constant 0 : i32
    return %c0_i32, %c0_i32_0 : i32, i32
  }
  func.func @transform_3(%arg0: i32, %arg1: i32) -> (i32, i32) {
    %c0_i32 = arith.constant 0 : i32
    %c0_i32_0 = arith.constant 0 : i32
    %c0_i32_1 = arith.constant 0 : i32
    return %c0_i32, %c0_i32_0 : i32, i32
  }
  func.func @transform_4(%arg0: i32, %arg1: i32) -> (i32, i32) {
    %c0_i32 = arith.constant 0 : i32
    %c0_i32_0 = arith.constant 0 : i32
    %c0_i32_1 = arith.constant 0 : i32
    return %c0_i32, %c0_i32_0 : i32, i32
  }
  func.func @transform_5(%arg0: i32, %arg1: i32) -> (i32, i32, i32) {
    %c0_i32 = arith.constant 0 : i32
    %c0_i32_0 = arith.constant 0 : i32
    return %arg0, %c0_i32, %arg1 : i32, i32, i32
  }
}

</mosaic_0001>

<bundles_post_ra>
// kernel: skip_connection.1
= control target key start
LH: loop header
LB: loop body
LE: loop exit
PB: predicated region body
PF: predicated region fallthrough
CT: control target
= control target key end

     0   :  { %s643_s18 = smov 0   ;;  %s645_s19 = smov 0   ;;  %s701_s0 = inlined_call_operand.vmem [shape: f32[2,4,256], index: 0, kind: input, shape index: {}, may-alias: {0,5}]   ;;  %s702_s1 = inlined_call_operand.vmem [shape: f32[4,4], index: 1, kind: input, shape index: {}]   ;;  %s703_s2 = inlined_call_operand.vmem [shape: f32[4,1], index: 2, kind: input, shape index: {}]   ;;  %s704_s3 = inlined_call_operand.vmem [shape: f32[4,4], index: 3, kind: input, shape index: {}]   ;;  %s705_s4 = inlined_call_operand.vmem [shape: f32[4,1], index: 4, kind: input, shape index: {}]   ;;  %s706_s5 = inlined_call_operand.vmem [shape: f32[2,4,256], index: 5, kind: output, shape index: {}, may-alias: {0,5}]  }
   0x1   :  { %s647_s20 = smov 0  }
   0x2 LB: > { %s27_s21 = sadd.s32 1, %s605_s19  ;;  %p544_p0 = scmp.ge.s32.totalorder %s609_s20, 1  ;;  %s609_s20 = sphi %s647_s20, %s15_s20   ;;  %s605_s19 = sphi %s645_s19, %s708_s19   ;;  %s601_s18 = sphi %s643_s18, %s707_s18  }
   0x3   : > { %p29_p1 = scmp.ge.s32.totalorder %s27_s21, 2  ;;  %p208_p2 = scmp.lt.s32.totalorder %s609_s20, 3 }
   0x5   : > { %s710_s21 = smov (%p29_p1, %s27_s21), 0  ;;  %p209_p3 = pnand %p544_p0, %p208_p2 }
   0x6   : > { %p245_p4 = scmp.lt.s32.totalorder (!%p209_p3), %s601_s18, 1 }
   0x7   : > { %212 = sbr.rel (%p209_p3) target bundleno = 424 (0x1a8), region = 40 }
   0xc   : > { %v611_v0 = vmov 0.0   ;;  %v266_v1 = vld [vmem:[%s703_s2] sm:$0xf]  ;;  %s712_s18 = smov (!%p245_p4, %s601_s18), 1  ;;  %v612_v2 = vmov 0   ;;  %vm278_vm0 = vcmask 1043456  }
   0xd   : > { %347 = vmatprep.mubr.f32.mxu0 %v611_v0  ;;  %440 = vmatprep.mubr.f32.mxu1 %v611_v0  ;;  %s557_s24 = sshll.u32 %s712_s18, 3  ;;  %v361_v3 = vld [vmem:[%s705_s4] sm:$0xf]  ;;  %vm274_vm1 = vcmask 31744  }
   0xe   : > { %585 = vset.pattern.permute.xlu0 %v612_v2  ;;  %s252_s29 = scalar_lea.vmem %s701_s0, %s557_s24  ;;  %v265_v6 = vld [vmem:[%s702_s1] sm:$0xf]  ;;  %s262_s11 = scalar_lea.vmem %s706_s5, %s557_s24 }
   0xf   : > { %269 = vperm.xlu0 %585, %v266_v1   ;;  %v264_v4 = vld [vmem:[%s252_s29] sm:$0xff] }
  0x10   : > { %v273_v5 = vcombine.high %v264_v4, %v264_v4  ;;  %v360_v15 = vld [vmem:[%s704_s3] sm:$0xf] }
  0x12   : > { %549 = vmatprep.subr.msk.mxu0 %vm278_vm0, %v273_v5 }
  0x13   : > { %364 = vperm.xlu0 %585, %v361_v3   ;;  %550 = vmatpush1.msk.msra.mxu0 %vm278_vm0, %v264_v4 }
  0x14   : > { %551 = vmatmul.mubr.msk.f32.vlgmr.msra.gmra.mxu0 %vm274_vm1, %v265_v6 }
  0x8a   : > { %v270_v7 = vpop.permute.xlu0 %269 }
  0x8e   : > { %v365_v18 = vpop.permute.xlu0 %364 }
  0xd4   : > { %v349_v8 = vpop.f32.mrf.mxu0 }
  0xd5   : > { %v350_v9 = vadd.f32 %v349_v8, %v270_v7 }
  0xd6   : > { %v351_v10 = vpop.f32.mrf.mxu0 }
  0xd7   : > { %v352_v11 = vadd.f32 %v351_v10, %v270_v7  ;;  %v356_v12 = vmul.f32 0.01, %v350_v9  ;;  %vm354_vm3 = vcmp.gt.f32.partialorder %v350_v9, 0.0 }
  0xd9   : > { %vm355_vm2 = vcmp.gt.f32.partialorder %v352_v11, 0.0  ;;  %v357_v13 = vmul.f32 0.01, %v352_v11  ;;  %v358_v16 = vsel %vm354_vm3, %v350_v9, %v356_v12 }
  0xdb   : > { %v359_v14 = vsel %vm355_vm2, %v352_v11, %v357_v13 }
  0xdc   : > { %552 = vmatprep.subr.msk.mxu1 %vm278_vm0, %v359_v14 }
  0xdd   : > { %553 = vmatpush1.msk.msra.mxu1 %vm278_vm0, %v358_v16 }
  0xde   : > { %554 = vmatmul.mubr.msk.f32.vlgmr.msra.gmra.mxu1 %vm274_vm1, %v360_v15 }
 0x19e   : > { %v442_v17 = vpop.f32.mrf.mxu1 }
 0x19f   : > { %v443_v20 = vadd.f32 %v442_v17, %v365_v18 }
 0x1a0   : > { %v444_v19 = vpop.f32.mrf.mxu1 }
 0x1a1   : > { %v445_v21 = vadd.f32 %v444_v19, %v365_v18 }
 0x1a3   : > { %v449_v22 = vcombine.low %v443_v20, %v445_v21 }
 0x1a5   : > { %v451_v23 = vadd.f32 %v449_v22, %v264_v4 }
 0x1a7   : > { %452 = vst [vmem:[%s262_s11] sm:$0xff] %v451_v23 }
 0x1a8 PF: > { %s15_s20 = sadd.s32 1, %s609_s20   ;;  %s707_s18 = smov %s605_s19 }
 0x1a9   : > { %p12_p5 = scmp.ge.s32.totalorder %s15_s20, 4   ;;  %s708_s19 = smov %s710_s21 }
 0x1ab   :  { %14 = sbr.rel (!%p12_p5) target bundleno = 2 (0x2), region = 70 }

</bundles_post_ra>
